<compile_context>
chip_gen: v7x
topology: tpu7x:2x2x1
jax: 0.10.0
libtpu: 0.0.40
codegen_flags: <defaults>
</compile_context>

<pallas_src>
import functools

import jax
import jax.numpy as jnp
from jax.experimental import pallas as pl
from jax.experimental.pallas import tpu as pltpu

_LANE = 128


def _round_up(x, m):
    return ((x + m - 1) // m) * m


def _label_smoothing_kernel(pred_ref, tgt_ref, out_ref, *,
                            classes, padding_idx, smoothing):
    logits = pred_ref[...].astype(jnp.float32)            # (TR, C)
    tgt = tgt_ref[...].astype(jnp.int32)                   # (TR, 1)

    # log-softmax pieces along the class (lane) axis.
    m = jnp.max(logits, axis=-1, keepdims=True)            # (TR, 1)  XLU
    z = logits - m                                          # (TR, C)  VPU
    lse = jnp.log(jnp.sum(jnp.exp(z), axis=-1, keepdims=True))  # EUP + XLU

    confidence = 1.0 - smoothing
    smooth_val = smoothing / (classes - 2)

    # (1, C) iota broadcast against the (TR, 1) target: no (TR, C) int32 temp.
    col = jax.lax.broadcasted_iota(jnp.int32, (1, z.shape[-1]), 1)
    z_tgt = jnp.sum(jnp.where(col == tgt, z, 0.0),
                    axis=-1, keepdims=True)                 # (TR, 1)
    # padding_idx is a compile-time constant -> static lane slice, no mask or
    # extra cross-lane reduce.
    z_pad = z[:, padding_idx:padding_idx + 1]               # (TR, 1)

    # sum_j true_dist[i,j] * logp[i,j]
    #   = smooth_val * (sum_j logp - logp_pad - logp_tgt) + confidence * logp_tgt
    logp_sum = jnp.sum(z, axis=-1, keepdims=True) - classes * lse
    logp_tgt = z_tgt - lse
    logp_pad = z_pad - lse
    row_loss = -(smooth_val * (logp_sum - logp_pad - logp_tgt)
                 + confidence * logp_tgt)                   # (TR, 1)
    # rows whose target is the padding index (incl. padded rows) contribute 0
    row_loss = jnp.where(tgt == padding_idx, 0.0, row_loss)

    # one cross-sublane reduce per block; with large row tiles num_blocks is
    # small so a full (8,128) tile-aligned slab per block is negligible.
    partial = jnp.sum(row_loss)
    out_ref[...] = jnp.full(out_ref.shape, partial, dtype=jnp.float32)


def _vmem_limit_bytes():
    """min(physical VMEM / 2, 64 MiB): 32 MiB on v7x, 64 MiB on v5e/v6e.

    The explicit limit is load-bearing on v5e, whose default scoped VMEM is
    only 16 MiB.
    """
    cap = None
    try:
        info = pltpu.get_tpu_info()
        for name in ("vmem_capacity_bytes", "vmem_size_bytes", "vmem_bytes"):
            v = getattr(info, name, None)
            if v:
                cap = int(v)
                break
    except Exception:
        cap = None
    if cap is None:
        cap = 64 << 20            # assume the smallest (v7x per-TC) -> safe
    return max(16 << 20, min(cap // 2, 64 << 20))


def _choose_tile_rows(n, c, itemsize, vmem_limit, align=32):
    """Row tile that keeps double-buffered inputs + f32 temporaries in VMEM."""
    c_lanes = _round_up(c, _LANE)   # narrow class dims are lane-padded in VMEM
    # 2x double-buffered native-width input + ~24 B/elem of f32 temporaries
    # (f32 cast, z, exp(z), compare mask, masked select) + target/row scratch.
    per_row = c_lanes * (2 * itemsize + 24) + 32
    budget = (vmem_limit * 3) // 4
    cap = max(align, (int(budget // per_row) // align) * align)
    max_rows = 32768 if c_lanes <= 512 else 8192
    cap = min(cap, max_rows)
    # keep >= 2 blocks whenever possible so the "parallel" grid axis can shard
    # across both TensorCores on v7x.
    cap = min(cap, max(align, _round_up(pl.cdiv(n, 2), align)))
    # never bigger than the (row-aligned) problem itself.
    cap = min(cap, _round_up(n, align))
    return cap


def label_smoothing_loss(pred, target, *, classes, padding_idx,
                         smoothing=0.0, tile_rows=None):
    """pred: (N, C) float (f32 or bf16); target: (N,) int. Returns scalar f32."""
    n, c = pred.shape
    assert c == classes
    assert classes > 2, "smoothing/(classes-2) requires classes > 2"

    vmem_limit = _vmem_limit_bytes()
    if tile_rows is None:
        tile_rows = _choose_tile_rows(
            n, c, jnp.dtype(pred.dtype).itemsize, vmem_limit)
    assert tile_rows % 8 == 0

    # Pad rows so the grid is exact; padded rows use target == padding_idx and
    # therefore contribute exactly 0 to the loss (divisor stays the real N).
    n_pad = pl.cdiv(n, tile_rows) * tile_rows
    tgt2d = target.astype(jnp.int32).reshape(n, 1)
    if n_pad != n:
        pred = jnp.pad(pred, ((0, n_pad - n), (0, 0)))
        tgt2d = jnp.pad(tgt2d, ((0, n_pad - n), (0, 0)),
                        constant_values=padding_idx)
    num_blocks = n_pad // tile_rows

    kernel = functools.partial(
        _label_smoothing_kernel,
        classes=classes, padding_idx=padding_idx, smoothing=smoothing)

    partials = pl.pallas_call(
        kernel,
        out_shape=jax.ShapeDtypeStruct((num_blocks, 8, 128), jnp.float32),
        grid_spec=pltpu.PrefetchScalarGridSpec(
            num_scalar_prefetch=0,
            grid=(num_blocks,),
            in_specs=[
                pl.BlockSpec((tile_rows, c), lambda i: (i, 0)),
                pl.BlockSpec((tile_rows, 1), lambda i: (i, 0)),
            ],
            out_specs=pl.BlockSpec((1, 8, 128), lambda i: (i, 0, 0)),
        ),
        compiler_params=pltpu.CompilerParams(
            dimension_semantics=("parallel",),          # independent blocks
            vmem_limit_bytes=vmem_limit),
    )(pred, tgt2d)

    # num_blocks is small with the large row tiles, so this strided pick is
    # cheap; every lane of a block's slab holds the same partial anyway.
    return jnp.sum(partials[:, 0, 0]) / jnp.float32(n)


def _reference(pred, target, *, classes, padding_idx, smoothing):
    logp = jax.nn.log_softmax(pred.astype(jnp.float32), axis=-1)
    n, c = pred.shape
    true_dist = jnp.full((n, c), smoothing / (classes - 2), jnp.float32)
    true_dist = true_dist.at[jnp.arange(n), target].set(1.0 - smoothing)
    true_dist = true_dist.at[:, padding_idx].set(0.0)
    true_dist = jnp.where((target == padding_idx)[:, None], 0.0, true_dist)
    return jnp.mean(jnp.sum(-true_dist * logp, axis=-1))


if __name__ == "__main__":
    key = jax.random.PRNGKey(0)
    classes, padding_idx, smoothing = 32, 0, 0.1   # n_class=32

    def make_inputs(n, k, dtype):
        k1, k2, k3 = jax.random.split(k, 3)
        pred = jax.random.normal(k1, (n, classes), dtype=jnp.float32).astype(dtype)
        tgt = jax.random.randint(k2, (n,), 1, classes, dtype=jnp.int32)
        pad_mask = jax.random.uniform(k3, (n,)) < 0.2   # some padding positions
        tgt = jnp.where(pad_mask, padding_idx, tgt)
        return pred, tgt

    # (n_rows, explicit tile_rows, dtype, tolerance)
    configs = [
        (64, None, jnp.float32, 1e-5),   # B=8, tgt_len=8; auto tiling (2 blocks)
        (64, 16,   jnp.float32, 1e-5),   # explicit small tile, 4-block grid
        (60, None, jnp.float32, 1e-5),   # N not a multiple of tile -> padding
        (64, None, jnp.bfloat16, 1e-4),  # bf16 on the wire, f32 inside
    ]
    for n, tr, dtype, tol in configs:
        key, sub = jax.random.split(key)
        pred, tgt = make_inputs(n, sub, dtype)
        loss = label_smoothing_loss(pred, tgt, classes=classes,
                                    padding_idx=padding_idx,
                                    smoothing=smoothing, tile_rows=tr)
        loss = jax.block_until_ready(loss)
        ref = _reference(pred, tgt, classes=classes,
                         padding_idx=padding_idx, smoothing=smoothing)
        assert jnp.allclose(loss, ref, rtol=tol, atol=tol), (n, tr, dtype, loss, ref)

    print("KERNEL_OK")
</pallas_src>

<mosaic_0001>
module attributes {stable_mosaic.version = 11 : i64} {
  func.func @_label_smoothing_kernel(%arg0: i32, %arg1: memref<32x32xf32, #tpu.memory_space<vmem>>, %arg2: memref<32x1xi32, #tpu.memory_space<vmem>>, %arg3: memref<1x8x128xf32, #tpu.memory_space<vmem>>) attributes {dimension_semantics = [#tpu.dimension_semantics<parallel>], iteration_bounds = array<i64: 2>, scalar_prefetch = 0 : i64, scratch_operands = 0 : i64, tpu.core_type = #tpu.core_type<tc>, window_params = [{transform_indices = @transform_0, window_bounds = array<i64: 32, 32>}, {transform_indices = @transform_1, window_bounds = array<i64: 32, 1>}, {transform_indices = @transform_2, window_bounds = array<i64: 1, 8, 128>}]} {
    %c0 = arith.constant 0 : index
    %c0_0 = arith.constant 0 : index
    %0 = vector.load %arg1[%c0, %c0_0] : memref<32x32xf32, #tpu.memory_space<vmem>>, vector<32x32xf32>
    %c0_1 = arith.constant 0 : index
    %c0_2 = arith.constant 0 : index
    %1 = vector.load %arg2[%c0_1, %c0_2] : memref<32x1xi32, #tpu.memory_space<vmem>>, vector<32x1xi32>
    %cst = arith.constant dense<0xFF800000> : vector<32xf32>
    %2 = vector.multi_reduction <maximumf>, %0, %cst [1] : vector<32x32xf32> to vector<32xf32>
    %3 = vector.shape_cast %2 : vector<32xf32> to vector<32x1xf32>
    %4 = vector.broadcast %3 : vector<32x1xf32> to vector<32x32xf32>
    %5 = arith.subf %0, %4 : vector<32x32xf32>
    %6 = math.exp %5 : vector<32x32xf32>
    %cst_3 = arith.constant dense<0.000000e+00> : vector<32xf32>
    %7 = vector.multi_reduction <add>, %6, %cst_3 [1] : vector<32x32xf32> to vector<32xf32>
    %8 = vector.shape_cast %7 : vector<32xf32> to vector<32x1xf32>
    %9 = math.log %8 : vector<32x1xf32>
    %10 = tpu.iota {dimensions = array<i32: 1>} : vector<1x32xi32>
    %11 = vector.broadcast %10 : vector<1x32xi32> to vector<32x32xi32>
    %12 = vector.broadcast %1 : vector<32x1xi32> to vector<32x32xi32>
    %13 = arith.cmpi eq, %11, %12 : vector<32x32xi32>
    %cst_4 = arith.constant 0.000000e+00 : f32
    %14 = vector.broadcast %cst_4 : f32 to vector<32x32xf32>
    %15 = arith.select %13, %5, %14 : vector<32x32xi1>, vector<32x32xf32>
    %cst_5 = arith.constant dense<0.000000e+00> : vector<32xf32>
    %16 = vector.multi_reduction <add>, %15, %cst_5 [1] : vector<32x32xf32> to vector<32xf32>
    %17 = vector.shape_cast %16 : vector<32xf32> to vector<32x1xf32>
    %18 = vector.extract_strided_slice %5 {offsets = [0, 0], sizes = [32, 1], strides = [1, 1]} : vector<32x32xf32> to vector<32x1xf32>
    %cst_6 = arith.constant dense<0.000000e+00> : vector<32xf32>
    %19 = vector.multi_reduction <add>, %5, %cst_6 [1] : vector<32x32xf32> to vector<32xf32>
    %20 = vector.shape_cast %19 : vector<32xf32> to vector<32x1xf32>
    %cst_7 = arith.constant 3.200000e+01 : f32
    %21 = vector.broadcast %cst_7 : f32 to vector<32x1xf32>
    %22 = arith.mulf %21, %9 : vector<32x1xf32>
    %23 = arith.subf %20, %22 : vector<32x1xf32>
    %24 = arith.subf %17, %9 : vector<32x1xf32>
    %25 = arith.subf %18, %9 : vector<32x1xf32>
    %26 = arith.subf %23, %25 : vector<32x1xf32>
    %27 = arith.subf %26, %24 : vector<32x1xf32>
    %cst_8 = arith.constant 0.00333333341 : f32
    %28 = vector.broadcast %cst_8 : f32 to vector<32x1xf32>
    %29 = arith.mulf %28, %27 : vector<32x1xf32>
    %cst_9 = arith.constant 0.899999976 : f32
    %30 = vector.broadcast %cst_9 : f32 to vector<32x1xf32>
    %31 = arith.mulf %30, %24 : vector<32x1xf32>
    %32 = arith.addf %29, %31 : vector<32x1xf32>
    %cst_10 = arith.constant 0.000000e+00 : f32
    %33 = vector.broadcast %cst_10 : f32 to vector<32x1xf32>
    %34 = arith.subf %33, %32 : vector<32x1xf32>
    %c0_i32 = arith.constant 0 : i32
    %35 = vector.broadcast %c0_i32 : i32 to vector<32x1xi32>
    %36 = arith.cmpi eq, %1, %35 : vector<32x1xi32>
    %cst_11 = arith.constant 0.000000e+00 : f32
    %37 = vector.broadcast %cst_11 : f32 to vector<32x1xf32>
    %38 = arith.select %36, %37, %34 : vector<32x1xi1>, vector<32x1xf32>
    %39 = vector.shape_cast %38 : vector<32x1xf32> to vector<1x32x1xf32>
    %cst_12 = arith.constant dense<0.000000e+00> : vector<1xf32>
    %40 = vector.multi_reduction <add>, %39, %cst_12 [1, 2] : vector<1x32x1xf32> to vector<1xf32>
    %41 = vector.shape_cast %40 : vector<1xf32> to vector<1x1x1xf32>
    %42 = vector.extract %41[0, 0, 0] : f32 from vector<1x1x1xf32>
    %43 = vector.broadcast %42 : f32 to vector<1x8x128xf32>
    %c0_13 = arith.constant 0 : index
    %c0_14 = arith.constant 0 : index
    %c0_15 = arith.constant 0 : index
    %44 = vector.load %arg3[%c0_13, %c0_14, %c0_15] : memref<1x8x128xf32, #tpu.memory_space<vmem>>, vector<1x8x128xf32>
    tpu.vector_store %arg3[%c0_13, %c0_14, %c0_15], %43 {strides = array<i32>} : memref<1x8x128xf32, #tpu.memory_space<vmem>>, vector<1x8x128xf32>,
    return
  }
  func.func @transform_0(%arg0: i32) -> (i32, i32) {
    %c0_i32 = arith.constant 0 : i32
    %c0_i32_0 = arith.constant 0 : i32
    return %arg0, %c0_i32 : i32, i32
  }
  func.func @transform_1(%arg0: i32) -> (i32, i32) {
    %c0_i32 = arith.constant 0 : i32
    %c0_i32_0 = arith.constant 0 : i32
    return %arg0, %c0_i32 : i32, i32
  }
  func.func @transform_2(%arg0: i32) -> (i32, i32, i32) {
    %c0_i32 = arith.constant 0 : i32
    %c0_i32_0 = arith.constant 0 : i32
    %c0_i32_1 = arith.constant 0 : i32
    return %arg0, %c0_i32, %c0_i32_0 : i32, i32, i32
  }
}

</mosaic_0001>

<bundles_post_ra>
// kernel: tpu_custom_call.1
= control target key start
LH: loop header
LB: loop body
LE: loop exit
PB: predicated region body
PF: predicated region fallthrough
CT: control target
= control target key end

     0   :  { %7 = vsyncpa [#allocation3], 0  ;;  %s733_s0 = inlined_call_operand.vmem [shape: f32[64,32], index: 0, kind: input, shape index: {}]   ;;  %s734_s1 = inlined_call_operand.vmem [shape: s32[64,1], index: 1, kind: input, shape index: {}]   ;;  %s735_s2 = inlined_call_operand.hbm [shape: f32[2,8,128], index: 2, kind: output, shape index: {}]  }
   0x1   :  { %9 = vsyncpa [#allocation3 + $0x1], 0  ;;  %s571_s9 = smov 0   ;;  %s573_s10 = smov 0  }
   0x2   :  { %s575_s11 = smov 0   ;;  %s577_s12 = smov 0  }
   0x3 LB: > { %s592_s13 = sadd.s32 4294967295, %s552_s12   ;;  %s417_s14 = sadd.s32 4294967294, %s552_s12   ;;  %s552_s12 = sphi %s577_s12, %s741_s12   ;;  %s548_s11 = sphi %s575_s11, %s740_s11   ;;  %s544_s10 = sphi %s573_s10, %s739_s10   ;;  %s540_s9 = sphi %s571_s9, %s738_s9  }
   0x4   : > { %s596_s15 = sadd.s32 1, %s552_s12   ;;  %s74_s16 = sadd.s32 1, %s548_s11 }
   0x5   : > { %s71_s17 = ssub.s32 %s552_s12, %s596_s15  ;;  %p84_p0 = scmp.ne.s32.totalorder %s548_s11, %s544_s10 }
   0x6   : > { %p72_p1 = scmp.eq.s32.totalorder %s71_s17, 0  ;;  %p85_p2 = scmp.eq.s32.totalorder %s592_s13, 1 }
   0x7   : > { %p90_p3 = scmp.ne.s32.totalorder %s544_s10, %s540_s9  ;;  %p91_p4 = scmp.eq.s32.totalorder %s417_s14, 1 }
   0x8   : > { %s607_s18 = scalar_select %p72_p1, %s548_s11, %s74_s16  }
   0x9   : > { %p609_p5 = por %p85_p2, %p84_p0  ;;  %p613_p6 = por %p91_p4, %p90_p3 }
   0xa   : > { %p420_p7 = scmp.ge.s32.totalorder %s552_s12, 1  ;;  %p127_p8 = scmp.lt.s32.totalorder %s552_s12, 3 }
   0xc   : > { %p128_p9 = pnand %p420_p7, %p127_p8 }
   0xd   : > { %s422_s21 = sshll.u32 (!%p128_p9), %s592_s13, 2  ;;  %v554_v0 = vmov (!%p128_p9), 0   ;;  %vm174_vm0 = vcmask (!%p128_p9), 261120   ;;  %v219_v25 = vlaneseq (!%p128_p9)  ;;  %vm313_vm7 = vcmask (!%p128_p9), 7168   ;;  %s151_s29 = sand.u32 (!%p128_p9), 1, %s544_s10  }
   0xe   : > { %131 = sbr.rel (%p128_p9) target bundleno = 588 (0x24c), region = 28  ;;  %p155_p10 = scmp.lt.s32.totalorder (!%p128_p9), %s422_s21, 7  ;;  %473 = vset.pattern.permute.xlu1 (!%p128_p9), %v554_v0  ;;  %472 = vset.pattern.permute.xlu0 (!%p128_p9), %v554_v0 }
   0xf   : > { %v220_v29 = vand.u32 (!%p128_p9), 127, %v219_v25  ;;  %s421_s30 = sshll.u32 (!%p128_p9), %s151_s29, 3  ;;  %s427_s5 = sshll.u32 (!%p128_p9), %s592_s13, 7 }
  0x10   : > { %s153_s3 = scalar_lea.vmem (!%p128_p9), [#allocation2], %s421_s30  ;;  %s693_s14 = scalar_lea.hbm (!%p128_p9), %s735_s2, %s427_s5 }
  0x11   : > { %s346_s4 = sshll.u32 (!%p128_p9), %s153_s3, 4  ;;  %s333_s16 = scalar_lea.sflag (!%p128_p9), [#allocation3], %s151_s29  ;;  %s688_s4 = int_to_ptr.vmem [resolvable:$true] %s346_s4 }
  0x12   : > { %s490_s17 = scalar_lea.vmem (!%p128_p9), %s688_s4, 128  ;;  %s555_s13 = smov (!%p128_p9), [#allocation2]  }
  0x13   : > { %p491_p11 = scmp.ne.s32.totalorder (!%p128_p9), %s688_s4, %s490_s17 }
  0x15   : > { %s743_s21 = smov (!%p155_p10, %s422_s21), 7  ;;  %p492_p12 = pnand %p491_p11, %p609_p5 }
  0x16   : > { %s423_s22 = sshll.u32 %s743_s21, 3  ;;  %s494_s21 = sshll.u32 %s555_s13, 4  ;;  %s495_s21 = int_to_ptr.vmem [resolvable:$false] %s494_s21 }
  0x17   : > { %s158_s25 = scalar_lea.vmem %s733_s0, %s423_s22  ;;  %s164_s28 = scalar_lea.vmem %s734_s1, %s423_s22 }
  0x18   : > { %v168_v1 = vld [vmem:[%s158_s25 + $0x10] sm:$0xff]  ;;  %v166_v2 = vld [vmem:[%s158_s25] sm:$0xff]  ;;  %v169_v3 = vld [vmem:[%s158_s25 + $0x18] sm:$0xff]  ;;  %p493_p13 = pneg %p492_p12  ;;  %s496_s22 = scalar_lea.vmem %s495_s21, 256 }
  0x19   : > { %v181_v4 = vsel %vm174_vm0, %v168_v1, -inf  ;;  %v175_v5 = vsel %vm174_vm0, %v166_v2, -inf  ;;  %v167_v6 = vld [vmem:[%s158_s25 + $0x8] sm:$0xff]  ;;  %v184_v7 = vsel %vm174_vm0, %v169_v3, -inf  ;;  %v633_v10 = vld [vmem:[%s164_s28 + $0x10] sm:$0xff]  ;;  %v635_v11 = vld [vmem:[%s164_s28] sm:$0xff]  ;;  %p497_p0 = scmp.lt.s32.totalorder %s688_s4, %s495_s21  ;;  %p498_p1 = scmp.lt.s32.totalorder %s496_s22, %s490_s17 }
  0x1a   : > { %182 = vmax.xlane.f32.xlu1 %v181_v4  ;;  %176 = vmax.xlane.f32.xlu0 %v175_v5  ;;  %v178_v8 = vsel %vm174_vm0, %v167_v6, -inf  ;;  %v630_v9 = vld [vmem:[%s164_s28 + $0x8] sm:$0xff]  ;;  %v639_v12 = vld [vmem:[%s164_s28 + $0x18] sm:$0xff]  ;;  %vm305_vm5 = vcmp.eq.s32.totalorder %v635_v11, 0  ;;  %vm307_vm8 = vcmp.eq.s32.totalorder %v633_v10, 0 }
  0x1b   : > { %vm306_vm6 = vcmp.eq.s32.totalorder %v630_v9, 0  ;;  %vm308_vm9 = vcmp.eq.s32.totalorder %v639_v12, 0  ;;  %p499_p2 = por %p498_p1, %p497_p0 }
  0x1d   : > { %p500_p3 = pnand %p499_p2, %p493_p13 }
  0x1e   : > { %185 = vmax.xlane.f32.xlu1 %v184_v7  ;;  %179 = vmax.xlane.f32.xlu0 %v178_v8 }
  0x2f   : > { %225 = vperm.xlu1 %473, %v630_v9  }
  0x33   : > { %228 = vperm.xlu1 %473, %v633_v10  }
  0x34   : > { %222 = vperm.xlu0 %472, %v635_v11  }
  0x37   : > { %231 = vperm.xlu1 %473, %v639_v12  }
  0xa7   : > { %v183_v13 = vpop.xlane.xlu1 %182  ;;  %v177_v14 = vpop.xlane.xlu0 %176 }
  0xa8   : > { %v642_v15 = vsub.f32 %v168_v1, %v183_v13  ;;  %v644_v16 = vsub.f32 %v166_v2, %v177_v14 }
  0xaa   : > { %v195_v17 = vmul.f32 1.442695, %v642_v15  ;;  %v191_v18 = vmul.f32 1.442695, %v644_v16  ;;  %v253_v39 = vsel %vm174_vm0, %v644_v16, 0.0  ;;  %v259_v40 = vsel %vm174_vm0, %v642_v15, 0.0 }
  0xab   : > { %v186_v19 = vpop.xlane.xlu1 %185  ;;  %v180_v20 = vpop.xlane.xlu0 %179 }
  0xac   : > { %474 = vpow2.f32 %v195_v17  ;;  %v648_v21 = vsub.f32 %v169_v3, %v186_v19  ;;  %v650_v22 = vsub.f32 %v167_v6, %v180_v20 }
  0xad   : > { %476 = vpow2.f32 %v191_v18 }
  0xae   : > { %v197_v23 = vmul.f32 1.442695, %v648_v21  ;;  %v193_v24 = vmul.f32 1.442695, %v650_v22  ;;  %v256_v42 = vsel %vm174_vm0, %v650_v22, 0.0  ;;  %v262_v43 = vsel %vm174_vm0, %v648_v21, 0.0 }
  0xaf   : > { %v226_v37 = vpop.permute.xlu1 %225 }
  0xb0   : > { %478 = vpow2.f32 %v197_v23  ;;  %vm234_vm2 = vcmp.eq.s32.totalorder %v220_v29, %v226_v37 }
  0xb1   : > { %480 = vpow2.f32 %v193_v24  ;;  %v238_v44 = vsel %vm234_vm2, %v650_v22, 0.0 }
  0xb2   : > { %v244_v46 = vsel %vm174_vm0, %v238_v44, 0.0 }
  0xb3   : > { %v223_v28 = vpop.permute.xlu0 %222  ;;  %v229_v41 = vpop.permute.xlu1 %228 }
  0xb4   : > { %vm233_vm1 = vcmp.eq.s32.totalorder %v220_v29, %v223_v28  ;;  %vm235_vm3 = vcmp.eq.s32.totalorder %v220_v29, %v229_v41 }
  0xb5   : > { %v237_v35 = vsel %vm233_vm1, %v644_v16, 0.0  ;;  %v239_v47 = vsel %vm235_vm3, %v642_v15, 0.0 }
  0xb6   : > { %v475_v26 = vpop.eup %474  ;;  %v241_v38 = vsel %vm174_vm0, %v237_v35, 0.0  ;;  %v247_v48 = vsel %vm174_vm0, %v239_v47, 0.0 }
  0xb7   : > { %v477_v27 = vpop.eup %476  ;;  %v205_v32 = vsel %vm174_vm0, %v475_v26, 0.0  ;;  %v232_v45 = vpop.permute.xlu1 %231 }
  0xb8   : > { %v199_v30 = vsel %vm174_vm0, %v477_v27, 0.0  ;;  %vm236_vm4 = vcmp.eq.s32.totalorder %v220_v29, %v232_v45 }
  0xb9   : > { %200 = vadd.xlane.f32.xlu1 %v199_v30  ;;  %v240_v49 = vsel %vm236_vm4, %v648_v21, 0.0 }
  0xba   : > { %v479_v31 = vpop.eup %478  ;;  %v250_v50 = vsel %vm174_vm0, %v240_v49, 0.0 }
  0xbb   : > { %v481_v33 = vpop.eup %480  ;;  %v208_v36 = vsel %vm174_vm0, %v479_v31, 0.0 }
  0xbc   : > { %v202_v34 = vsel %vm174_vm0, %v481_v33, 0.0 }
  0xbd   : > { %206 = vadd.xlane.f32.xlu1 %v205_v32  ;;  %203 = vadd.xlane.f32.xlu0 %v202_v34 }
  0xc1   : > { %209 = vadd.xlane.f32.xlu1 %v208_v36  ;;  %242 = vadd.xlane.f32.xlu0 %v241_v38 }
  0xc5   : > { %254 = vadd.xlane.f32.xlu1 %v253_v39  ;;  %260 = vadd.xlane.f32.xlu0 %v259_v40 }
  0xc9   : > { %257 = vadd.xlane.f32.xlu1 %v256_v42  ;;  %263 = vadd.xlane.f32.xlu0 %v262_v43 }
  0xcd   : > { %245 = vadd.xlane.f32.xlu1 %v244_v46 }
  0xd1   : > { %248 = vadd.xlane.f32.xlu1 %v247_v48 }
  0xd5   : > { %251 = vadd.xlane.f32.xlu1 %v250_v50 }
 0x146   : > { %v201_v51 = vpop.xlane.xlu1 %200 }
 0x147   : > { %482 = vlog2.f32 %v201_v51 }
 0x14a   : > { %v207_v52 = vpop.xlane.xlu1 %206  ;;  %v204_v53 = vpop.xlane.xlu0 %203 }
 0x14b   : > { %484 = vlog2.f32 %v207_v52 }
 0x14c   : > { %486 = vlog2.f32 %v204_v53 }
 0x14e   : > { %v210_v54 = vpop.xlane.xlu1 %209  ;;  %v243_v56 = vpop.xlane.xlu0 %242 }
 0x14f   : > { %488 = vlog2.f32 %v210_v54 }
 0x151   : > { %v483_v55 = vpop.eup %482 }
 0x152   : > { %v212_v57 = vmul.f32 0.6931472, %v483_v55  ;;  %v255_v58 = vpop.xlane.xlu1 %254  ;;  %v261_v3 = vpop.xlane.xlu0 %260 }
 0x154   : > { %v265_v59 = vmul.f32 32.0, %v212_v57  ;;  %v277_v63 = vsub.f32 %v644_v16, %v212_v57  ;;  %v273_v4 = vsub.f32 %v243_v56, %v212_v57 }
 0x155   : > { %v485_v60 = vpop.eup %484 }
 0x156   : > { %v487_v61 = vpop.eup %486  ;;  %v216_v62 = vmul.f32 0.6931472, %v485_v60  ;;  %v269_v0 = vsub.f32 %v255_v58, %v265_v59  ;;  %v258_v1 = vpop.xlane.xlu1 %257  ;;  %v293_v24 = vmul.f32 0.9, %v273_v4 }
 0x157   : > { %v214_v2 = vmul.f32 0.6931472, %v487_v61  ;;  %v264_v28 = vpop.xlane.xlu0 %263 }
 0x158   : > { %v281_v5 = vsub.f32 %v269_v0, %v277_v63  ;;  %v267_v6 = vmul.f32 32.0, %v216_v62  ;;  %v279_v26 = vsub.f32 %v642_v15, %v216_v62 }
 0x159   : > { %v489_v7 = vpop.eup %488  ;;  %v266_v8 = vmul.f32 32.0, %v214_v2  ;;  %v278_v20 = vsub.f32 %v650_v22, %v214_v2 }
 0x15a   : > { %v218_v13 = vmul.f32 0.6931472, %v489_v7  ;;  %v285_v14 = vsub.f32 %v281_v5, %v273_v4  ;;  %v246_v17 = vpop.xlane.xlu1 %245  ;;  %v271_v18 = vsub.f32 %v261_v3, %v267_v6 }
 0x15b   : > { %v270_v19 = vsub.f32 %v258_v1, %v266_v8  ;;  %v274_v23 = vsub.f32 %v246_v17, %v214_v2 }
 0x15c   : > { %v289_v25 = vmul.f32 0.0033333334, %v285_v14  ;;  %v268_v16 = vmul.f32 32.0, %v218_v13  ;;  %v283_v32 = vsub.f32 %v271_v18, %v279_v26  ;;  %v280_v35 = vsub.f32 %v648_v21, %v218_v13 }
 0x15d   : > { %v282_v27 = vsub.f32 %v270_v19, %v278_v20  ;;  %v294_v38 = vmul.f32 0.9, %v274_v23 }
 0x15e   : > { %v297_v29 = vadd.f32 %v293_v24, %v289_v25  ;;  %v272_v30 = vsub.f32 %v264_v28, %v268_v16  ;;  %v249_v31 = vpop.xlane.xlu1 %248 }
 0x15f   : > { %v286_v33 = vsub.f32 %v282_v27, %v274_v23  ;;  %v275_v34 = vsub.f32 %v249_v31, %v216_v62 }
 0x160   : > { %v301_v36 = vsub.f32 0.0, %v297_v29  ;;  %v284_v39 = vsub.f32 %v272_v30, %v280_v35 }
 0x161   : > { %v290_v37 = vmul.f32 0.0033333334, %v286_v33  ;;  %v287_v22 = vsub.f32 %v283_v32, %v275_v34  ;;  %v295_v42 = vmul.f32 0.9, %v275_v34 }
 0x162   : > { %v252_v40 = vpop.xlane.xlu1 %251  ;;  %v309_v47 = vsel %vm305_vm5, 0.0, %v301_v36 }
 0x163   : > { %v298_v41 = vadd.f32 %v294_v38, %v290_v37  ;;  %v291_v15 = vmul.f32 0.0033333334, %v287_v22  ;;  %v276_v43 = vsub.f32 %v252_v40, %v218_v13  ;;  %v314_v11 = vsel %vm313_vm7, %v309_v47, 0.0 }
 0x165   : > { %v302_v44 = vsub.f32 0.0, %v298_v41  ;;  %v299_v45 = vadd.f32 %v295_v42, %v291_v15  ;;  %v288_v46 = vsub.f32 %v284_v39, %v276_v43  ;;  %v296_v50 = vmul.f32 0.9, %v276_v43 }
 0x167   : > { %v310_v21 = vsel %vm306_vm6, 0.0, %v302_v44  ;;  %v303_v48 = vsub.f32 0.0, %v299_v45  ;;  %v292_v49 = vmul.f32 0.0033333334, %v288_v46 }
 0x168   : > { %v315_v51 = vsel %vm313_vm7, %v310_v21, 0.0 }
 0x169   : > { %v300_v52 = vadd.f32 %v296_v50, %v292_v49  ;;  %v311_v53 = vsel %vm307_vm8, 0.0, %v303_v48  ;;  %v316_v54 = vadd.f32 %v315_v51, %v314_v11 }
 0x16a   : > { %v317_v9 = vsel %vm313_vm7, %v311_v53, 0.0 }
 0x16b   : > { %v304_v55 = vsub.f32 0.0, %v300_v52  ;;  %v318_v56 = vadd.f32 %v317_v9, %v316_v54 }
 0x16d   : > { %v312_v57 = vsel %vm308_vm9, 0.0, %v304_v55 }
 0x16e   : > { %v319_v10 = vsel %vm313_vm7, %v312_v57, 0.0 }
 0x16f   : > { %v320_v58 = vadd.f32 %v319_v10, %v318_v56 }
 0x171   : > { %321 = vadd.xlane.f32.xlu0 %v320_v58 }
 0x1fe   : > { %v322_v59 = vpop.xlane.xlu0 %321 }
 0x1ff   : > { %v323_v60 = vrot.slane %v322_v59, 4 }
 0x201   : > { %v324_v61 = vadd.f32 %v323_v60, %v322_v59 }
 0x203   : > { %v325_v62 = vrot.slane %v324_v61, 2 }
 0x205   : > { %v326_v63 = vadd.f32 %v325_v62, %v324_v61 }
 0x207   : > { %v327_v0 = vrot.slane %v326_v63, 1 }
 0x209   : > { %v328_v1 = vadd.f32 %v327_v0, %v326_v63 }
 0x20b   : > { %430 = vpush %v328_v1 }
 0x23c   : > { %s431_s6 = spop %430 }
 0x23d   : > { %v330_v12 = vstv %s431_s6 }
 0x23e   : > { %331 = vst [vmem:[%s153_s3] sm:$0xff] %v330_v12 }
 0x23f   : > { %503 = shalt.err (!%p500_p3)
}
 0x240   : > { %s504_s23 = scalar_lea.hbm %s693_s14, 128  ;;  %s508_s26 = scalar_lea.hbm %s735_s2, 256 }
 0x241   : > { %p505_p4 = scmp.ne.s32.totalorder %s693_s14, %s504_s23  ;;  %p509_p9 = scmp.lt.u32.totalorder %s693_s14, %s735_s2 }
 0x242   : > { %p510_p10 = scmp.lt.u32.totalorder %s508_s26, %s504_s23  ;;  %p512_p12 = scmp.lt.u32.totalorder %s504_s23, %s693_s14 }
 0x243   : > { %p506_p7 = pnand %p505_p4, %p609_p5 }
 0x244   : > { %p511_p11 = por %p510_p10, %p509_p9 }
 0x245   : > { %p507_p8 = pneg %p506_p7 }
 0x246   : > { %p513_p13 = por %p512_p12, %p511_p11 }
 0x248   : > { %p514_p0 = pnand %p513_p13, %p507_p8 }
 0x24a   : > { %517 = shalt.err (!%p514_p0)
}
 0x24b   : > { %432 = dma.vmem_to_hbm [thread:$0]  (%p609_p5), %s688_s4, 128, %s693_s14, %s333_s16  }
 0x24c PF: > { %p438_p1 = scmp.ge.s32.totalorder %s552_s12, 2  ;;  %s358_s29 = sand.u32 1, %s540_s9  }
 0x24d   : > { %s359_s30 = scalar_lea.sflag [#allocation3], %s358_s29 }
 0x24e   : > { %p435_p2 = pnand %p438_p1, %p613_p6 }
 0x250   : > { %535 = dma.done.wait (!%p435_p2), %s359_s30, 128  }
 0x251   : > { %537 = vsyncadd (!%p435_p2), %s359_s30, 4294967168  ;;  %p12_p3 = scmp.ge.s32.totalorder %s596_s15, 4   ;;  %s738_s9 = smov %s544_s10 }
 0x252   : > { %s739_s10 = smov %s548_s11  ;;  %s740_s11 = smov %s607_s18 }
 0x253   : > { %s741_s12 = smov %s596_s15  ;;  %14 = sbr.rel (!%p12_p3) target bundleno = 3 (0x3), region = 66 }
 0x25a   :  { %364 = vsyncpa [#allocation3], 1 }
 0x25b   :  { %366 = vsyncpa [#allocation3 + $0x1], 1 }

</bundles_post_ra>
